<compile_context>
chip_gen: v7x
topology: tpu7x:2x2x1
jax: 0.10.0
libtpu: 0.0.40
codegen_flags: <defaults>
</compile_context>

<pallas_src>
import functools

import jax
import jax.numpy as jnp
from jax.experimental import pallas as pl
from jax.experimental.pallas import tpu as pltpu


_NEG_INF = -1e30


def _round_up(x, m):
    return ((x + m - 1) // m) * m


def deepdr_vbc_kernel(x_ref, w1_ref, b1_ref, w2_ref, b2_ref,
                      probs_ref, acc_ref, *,
                      inv_spatial, s_true, ragged, unroll):
    """Fused global-average-pool -> MLP -> softmax.

    x_ref:     (TB, C, TS)     image chunk, native dtype (cast on-chip)
    w1_ref:    (C, HID_PAD)    f32
    b1_ref:    (1, HID_PAD)    f32
    w2_ref:    (HID_PAD, NCP)  f32 (padded class columns are zero)
    b2_ref:    (1, NCP)        f32 (padded class entries are -1e30)
    probs_ref: (1, TB, NCP)    f32, written only on the last spatial tile
    acc_ref:   (TB, C, 128)    f32 lane-resident partial sums
    """
    k = pl.program_id(1)
    last = pl.num_programs(1) - 1
    tb, c, ts = x_ref.shape
    n_slabs = ts // 128

    @pl.when(k == 0)
    def _init():
        acc_ref[...] = jnp.zeros_like(acc_ref)

    def accum(masked):
        # Stream 128-lane slabs from VMEM; keep only a (tb, c, 128) psum in
        # vregs (a full multi-MiB tile would blow the 64-vreg file).
        lane = jax.lax.broadcasted_iota(jnp.int32, (tb, c, 128), 2)
        base = k * ts

        def body(i, psum):
            start = pl.multiple_of(i * 128, 128)
            slab = x_ref[:, :, pl.ds(start, 128)].astype(jnp.float32)
            if masked:
                slab = jnp.where(base + i * 128 + lane < s_true, slab, 0.0)
            return psum + slab

        return jax.lax.fori_loop(0, n_slabs, body,
                                 jnp.zeros((tb, c, 128), jnp.float32),
                                 unroll=unroll)

    if ragged:
        # Only the last spatial tile can contain out-of-range lanes; mask it
        # against the true H*W, keep the bulk path mask-free.
        @pl.when(k == last)
        def _tail():
            acc_ref[...] += accum(True)

        @pl.when(k != last)
        def _bulk():
            acc_ref[...] += accum(False)
    else:
        acc_ref[...] += accum(False)

    @pl.when(k == last)
    def _finalize():
        # Single cross-lane reduce for the whole kernel; mean over the true
        # spatial size (masked / zero-padded lanes do not bias the sum).
        pooled = jnp.sum(acc_ref[...], axis=-1) * inv_spatial          # (TB, C)

        h = jnp.dot(pooled, w1_ref[...], preferred_element_type=jnp.float32)
        h = jnp.maximum(h + b1_ref[...], 0.0)                          # ReLU
        logits = jnp.dot(h, w2_ref[...],
                         preferred_element_type=jnp.float32) + b2_ref[...]

        # Stable softmax over 128 lanes; padded classes carry -1e30 bias so
        # exp() underflows to 0 and the real-class probabilities are exact.
        m = jnp.max(logits, axis=-1, keepdims=True)
        e = jnp.exp(logits - m)
        probs_ref[0] = e / jnp.sum(e, axis=-1, keepdims=True)


@jax.jit
def deepdr_vbc_predict(x_nchw, params):
    """Equivalent of DeepDrVBC.predict: deepdr(x) -> softmax(dim=1) -> argmax."""
    w1, b1, w2, b2 = params
    B, C, H, W = x_nchw.shape
    S = H * W
    hid = w1.shape[1]
    n_cls = w2.shape[1]

    # Pad hidden dim to a lane-friendly multiple of 128 (zero padding keeps
    # logits identical); pad classes to 128 lanes with -1e30 bias so the
    # second matmul and probs writeback are lane-dense.
    hid_pad = _round_up(hid, 128)
    ncp = 128
    w1p = jnp.pad(w1.astype(jnp.float32), ((0, 0), (0, hid_pad - hid)))
    b1p = jnp.pad(b1.astype(jnp.float32),
                  ((0, hid_pad - hid),)).reshape(1, hid_pad)
    w2p = jnp.pad(w2.astype(jnp.float32),
                  ((0, hid_pad - hid), (0, ncp - n_cls)))
    b2p = jnp.pad(b2.astype(jnp.float32), ((0, ncp - n_cls),),
                  constant_values=_NEG_INF).reshape(1, ncp)

    # Keep the image in its native dtype (kernel casts on-chip). No spatial
    # padding pass: the ragged tail is masked in-kernel. Only tiny images
    # (S < 128) are padded once up to 128 lanes.
    x3 = x_nchw.reshape(B, C, S)
    s_arr = S
    if S < 128:
        s_arr = 128
        x3 = jnp.pad(x3, ((0, 0), (0, 0), (0, s_arr - S)))

    dtype_bytes = jnp.dtype(x3.dtype).itemsize
    cpad = _round_up(C, 8)

    # Batch tile: >= 2 tiles whenever B >= 2 so both v7x TensorCores drive
    # their own DMA stream; capped at 8 rows per tile.
    TB = 1 if B <= 1 else min(8, (B + 1) // 2)
    nb = pl.cdiv(B, TB)

    # Spatial tile: ~3 MiB useful HBM bytes per block (padded VMEM block
    # <= ~6 MiB so double-buffering stays well under the scoped VMEM limit
    # on every TPU generation), multiple of 128 lanes, never exceeding S.
    useful_budget = (3 << 20) // max(1, TB * C * dtype_bytes)
    padded_budget = (6 << 20) // max(1, TB * cpad * dtype_bytes)
    TS = min(useful_budget, padded_budget, s_arr)
    TS = max(128, (TS // 128) * 128)
    ns = pl.cdiv(s_arr, TS)
    ragged = (s_arr % TS) != 0

    # Modest unroll of the streaming loop, bounded by vreg pressure.
    vregs_per_slab = max(1, (TB * cpad) // 8)
    unroll = max(1, min(8, 32 // vregs_per_slab, TS // 128))

    # VMEM budget derived from actual buffer sizes (double-buffered inputs +
    # resident weights + accumulator), clamped to [16, 40] MiB.
    vmem_need = (2 * (TB * cpad * TS * dtype_bytes
                      + 4 * (cpad * hid_pad + hid_pad + hid_pad * ncp + ncp)
                      + 4 * 8 * ncp)
                 + 4 * TB * cpad * 128
                 + (4 << 20))
    vmem_limit = int(min(max(vmem_need, 16 << 20), 40 << 20))

    kernel = functools.partial(
        deepdr_vbc_kernel,
        inv_spatial=1.0 / float(S), s_true=S, ragged=ragged, unroll=unroll)

    probs_pad = pl.pallas_call(
        kernel,
        grid=(nb, ns),
        in_specs=[
            pl.BlockSpec((TB, C, TS), lambda b, k: (b, 0, k)),
            pl.BlockSpec((C, hid_pad), lambda b, k: (0, 0)),
            pl.BlockSpec((1, hid_pad), lambda b, k: (0, 0)),
            pl.BlockSpec((hid_pad, ncp), lambda b, k: (0, 0)),
            pl.BlockSpec((1, ncp), lambda b, k: (0, 0)),
        ],
        out_specs=pl.BlockSpec((1, TB, ncp), lambda b, k: (b, 0, 0)),
        out_shape=jax.ShapeDtypeStruct((nb, TB, ncp), jnp.float32),
        scratch_shapes=[pltpu.VMEM((TB, C, 128), jnp.float32)],
        compiler_params=pltpu.CompilerParams(
            dimension_semantics=("parallel", "arbitrary"),
            vmem_limit_bytes=vmem_limit),
    )(x3, w1p, b1p, w2p, b2p)

    # Drop batch-padding rows and class-padding lanes in the wrapper.
    probs = probs_pad.reshape(nb * TB, ncp)[:B, :n_cls]

    # argmax over the 2 classes; ties -> index 0 (matches torch first-max).
    labels = (probs[:, 1] > probs[:, 0]).astype(jnp.int32)
    return probs, labels


def deepdr_vbc_forward(data_iter, params):
    """Equivalent of DeepDrVBC.forward: iterate data, predict, tag BRVO/CRVO.

    All iterator items are stacked into one batch: one kernel launch and one
    host sync (device_get) instead of one per item.
    """
    results = {}
    all_images, all_names = [], []
    for images, names in data_iter:
        all_images.append(jnp.asarray(images))
        all_names.extend(names)
    if not all_images:
        return results, None

    x = all_images[0] if len(all_images) == 1 else jnp.concatenate(
        all_images, axis=0)
    _, labels = deepdr_vbc_predict(x, params)

    labels_host = jax.device_get(labels)
    for i, name in enumerate(all_names):
        results[name] = 'BRVO' if int(labels_host[i]) == 1 else 'CRVO'
    return results, labels


def make_params(key, c_in, hidden, n_classes=2):
    k1, k2, k3, k4 = jax.random.split(key, 4)
    w1 = jax.random.normal(k1, (c_in, hidden), jnp.float32) * 0.1
    b1 = jax.random.normal(k2, (hidden,), jnp.float32) * 0.01
    w2 = jax.random.normal(k3, (hidden, n_classes), jnp.float32) * 0.1
    b2 = jax.random.normal(k4, (n_classes,), jnp.float32) * 0.01
    return (w1, b1, w2, b2)


if __name__ == "__main__":
    key = jax.random.PRNGKey(0)
    k_params, k_data = jax.random.split(key)

    B, C, H, W = 2, 4, 16, 16
    HIDDEN = 32

    params = make_params(k_params, C, HIDDEN)
    images = jax.random.normal(k_data, (B, C, H, W), jnp.float32)
    names = [f"img_{i}" for i in range(B)]
    data_iter = [(images, names)]

    # Kernel vs. pure-JAX reference (same head definition).
    probs, labels = deepdr_vbc_predict(images, params)
    jax.block_until_ready(probs)

    w1, b1, w2, b2 = params
    pooled_ref = jnp.mean(images.reshape(B, C, H * W), axis=-1)
    h_ref = jnp.maximum(pooled_ref @ w1 + b1, 0.0)
    logits_ref = h_ref @ w2 + b2
    probs_ref = jax.nn.softmax(logits_ref, axis=1)
    labels_ref = jnp.argmax(probs_ref, axis=1).astype(jnp.int32)
    assert jnp.allclose(probs, probs_ref, atol=1e-5, rtol=1e-5)
    assert jnp.array_equal(labels, labels_ref)

    results, labels_out = deepdr_vbc_forward(data_iter, params)
    jax.block_until_ready(labels_out)

    assert set(results.keys()) == set(names)
    assert all(tag in ("BRVO", "CRVO") for tag in results.values())
    print("KERNEL_OK")
</pallas_src>

<mosaic_0001>
module attributes {stable_mosaic.version = 11 : i64} {
  func.func @deepdr_vbc_kernel(%arg0: i32, %arg1: i32, %arg2: memref<1x4x256xf32, #tpu.memory_space<vmem>>, %arg3: memref<4x128xf32, #tpu.memory_space<vmem>>, %arg4: memref<1x128xf32, #tpu.memory_space<vmem>>, %arg5: memref<128x128xf32, #tpu.memory_space<vmem>>, %arg6: memref<1x128xf32, #tpu.memory_space<vmem>>, %arg7: memref<1x1x128xf32, #tpu.memory_space<vmem>>, %arg8: memref<1x4x128xf32, #tpu.memory_space<vmem>>) attributes {dimension_semantics = [#tpu.dimension_semantics<parallel>, #tpu.dimension_semantics<arbitrary>], iteration_bounds = array<i64: 2, 1>, scalar_prefetch = 0 : i64, scratch_operands = 1 : i64, tpu.core_type = #tpu.core_type<tc>, window_params = [{transform_indices = @transform_0, window_bounds = array<i64: 1, 4, 256>}, {pipeline_mode = #tpu.pipeline_mode<synchronous>, transform_indices = @transform_1, window_bounds = array<i64: 4, 128>}, {pipeline_mode = #tpu.pipeline_mode<synchronous>, transform_indices = @transform_2, window_bounds = array<i64: 1, 128>}, {pipeline_mode = #tpu.pipeline_mode<synchronous>, transform_indices = @transform_3, window_bounds = array<i64: 128, 128>}, {pipeline_mode = #tpu.pipeline_mode<synchronous>, transform_indices = @transform_4, window_bounds = array<i64: 1, 128>}, {transform_indices = @transform_5, window_bounds = array<i64: 1, 1, 128>}]} {
    %c0_i32 = arith.constant 0 : i32
    %0 = arith.cmpi eq, %arg1, %c0_i32 : i32
    %1 = arith.extui %0 : i1 to i32
    %c0_i32_0 = arith.constant 0 : i32
    %2 = arith.cmpi ne, %1, %c0_i32_0 : i32
    scf.if %2 {
      %cst_14 = arith.constant 0.000000e+00 : f32
      %20 = vector.broadcast %cst_14 : f32 to vector<1x4x128xf32>
      %c0_15 = arith.constant 0 : index
      %c0_16 = arith.constant 0 : index
      %c0_17 = arith.constant 0 : index
      %21 = vector.load %arg8[%c0_15, %c0_16, %c0_17] : memref<1x4x128xf32, #tpu.memory_space<vmem>>, vector<1x4x128xf32>
      tpu.vector_store %arg8[%c0_15, %c0_16, %c0_17], %20 {strides = array<i32>} : memref<1x4x128xf32, #tpu.memory_space<vmem>>, vector<1x4x128xf32>,
    } else {
    }
    %c0 = arith.constant 0 : index
    %c0_1 = arith.constant 0 : index
    %c0_2 = arith.constant 0 : index
    %3 = vector.load %arg8[%c0, %c0_1, %c0_2] : memref<1x4x128xf32, #tpu.memory_space<vmem>>, vector<1x4x128xf32>
    %cst = arith.constant 0.000000e+00 : f32
    %4 = vector.broadcast %cst : f32 to vector<1x4x128xf32>
    %c0_i32_3 = arith.constant 0 : i32
    %c128_i32 = arith.constant 128 : i32
    %5 = arith.muli %c0_i32_3, %c128_i32 : i32
    %6 = tpu.assume_multiple %5, 128 : i32
    %c0_4 = arith.constant 0 : index
    %c0_5 = arith.constant 0 : index
    %7 = arith.index_cast %6 : i32 to index
    %8 = vector.load %arg2[%c0_4, %c0_5, %7] : memref<1x4x256xf32, #tpu.memory_space<vmem>>, vector<1x4x128xf32>
    %9 = arith.addf %4, %8 : vector<1x4x128xf32>
    %c1_i32 = arith.constant 1 : i32
    %c128_i32_6 = arith.constant 128 : i32
    %10 = arith.muli %c1_i32, %c128_i32_6 : i32
    %11 = tpu.assume_multiple %10, 128 : i32
    %c0_7 = arith.constant 0 : index
    %c0_8 = arith.constant 0 : index
    %12 = arith.index_cast %11 : i32 to index
    %13 = vector.load %arg2[%c0_7, %c0_8, %12] : memref<1x4x256xf32, #tpu.memory_space<vmem>>, vector<1x4x128xf32>
    %14 = arith.addf %9, %13 : vector<1x4x128xf32>
    %c2_i32 = arith.constant 2 : i32
    %15 = arith.addf %3, %14 : vector<1x4x128xf32>
    %c0_9 = arith.constant 0 : index
    %c0_10 = arith.constant 0 : index
    %c0_11 = arith.constant 0 : index
    %16 = vector.load %arg8[%c0_9, %c0_10, %c0_11] : memref<1x4x128xf32, #tpu.memory_space<vmem>>, vector<1x4x128xf32>
    tpu.vector_store %arg8[%c0_9, %c0_10, %c0_11], %15 {strides = array<i32>} : memref<1x4x128xf32, #tpu.memory_space<vmem>>, vector<1x4x128xf32>,
    %c0_i32_12 = arith.constant 0 : i32
    %17 = arith.cmpi eq, %arg1, %c0_i32_12 : i32
    %18 = arith.extui %17 : i1 to i32
    %c0_i32_13 = arith.constant 0 : i32
    %19 = arith.cmpi ne, %18, %c0_i32_13 : i32
    scf.if %19 {
      %c0_14 = arith.constant 0 : index
      %c0_15 = arith.constant 0 : index
      %c0_16 = arith.constant 0 : index
      %20 = vector.load %arg8[%c0_14, %c0_15, %c0_16] : memref<1x4x128xf32, #tpu.memory_space<vmem>>, vector<1x4x128xf32>
      %cst_17 = arith.constant dense<0.000000e+00> : vector<1x4xf32>
      %21 = vector.multi_reduction <add>, %20, %cst_17 [2] : vector<1x4x128xf32> to vector<1x4xf32>
      %cst_18 = arith.constant 3.906250e-03 : f32
      %22 = vector.broadcast %cst_18 : f32 to vector<1x4xf32>
      %23 = arith.mulf %21, %22 : vector<1x4xf32>
      %c0_19 = arith.constant 0 : index
      %c0_20 = arith.constant 0 : index
      %24 = vector.load %arg3[%c0_19, %c0_20] : memref<4x128xf32, #tpu.memory_space<vmem>>, vector<4x128xf32>
      %cst_21 = arith.constant dense<0.000000e+00> : vector<1x128xf32>
      %25 = tpu.matmul %23, %24, %cst_21 {dimension_numbers = #tpu.dot_dimension_numbers<[1], [0], [0], [1], [0, 0, 1, 1], [], []>} : vector<1x4xf32>, vector<4x128xf32>, vector<1x128xf32> -> vector<1x128xf32>
      %c0_22 = arith.constant 0 : index
      %c0_23 = arith.constant 0 : index
      %26 = vector.load %arg4[%c0_22, %c0_23] : memref<1x128xf32, #tpu.memory_space<vmem>>, vector<1x128xf32>
      %27 = arith.addf %25, %26 : vector<1x128xf32>
      %cst_24 = arith.constant 0.000000e+00 : f32
      %28 = vector.broadcast %cst_24 : f32 to vector<1x128xf32>
      %29 = arith.maximumf %27, %28 : vector<1x128xf32>
      %c0_25 = arith.constant 0 : index
      %c0_26 = arith.constant 0 : index
      %30 = vector.load %arg5[%c0_25, %c0_26] : memref<128x128xf32, #tpu.memory_space<vmem>>, vector<128x128xf32>
      %cst_27 = arith.constant dense<0.000000e+00> : vector<1x128xf32>
      %31 = tpu.matmul %29, %30, %cst_27 {dimension_numbers = #tpu.dot_dimension_numbers<[1], [0], [0], [1], [0, 0, 1, 1], [], []>} : vector<1x128xf32>, vector<128x128xf32>, vector<1x128xf32> -> vector<1x128xf32>
      %c0_28 = arith.constant 0 : index
      %c0_29 = arith.constant 0 : index
      %32 = vector.load %arg6[%c0_28, %c0_29] : memref<1x128xf32, #tpu.memory_space<vmem>>, vector<1x128xf32>
      %33 = arith.addf %31, %32 : vector<1x128xf32>
      %cst_30 = arith.constant dense<0xFF800000> : vector<1xf32>
      %34 = vector.multi_reduction <maximumf>, %33, %cst_30 [1] : vector<1x128xf32> to vector<1xf32>
      %35 = vector.shape_cast %34 : vector<1xf32> to vector<1x1xf32>
      %36 = vector.broadcast %35 : vector<1x1xf32> to vector<1x128xf32>
      %37 = arith.subf %33, %36 : vector<1x128xf32>
      %38 = math.exp %37 : vector<1x128xf32>
      %cst_31 = arith.constant dense<0.000000e+00> : vector<1xf32>
      %39 = vector.multi_reduction <add>, %38, %cst_31 [1] : vector<1x128xf32> to vector<1xf32>
      %40 = vector.shape_cast %39 : vector<1xf32> to vector<1x1xf32>
      %41 = vector.broadcast %40 : vector<1x1xf32> to vector<1x128xf32>
      %42 = arith.divf %38, %41 : vector<1x128xf32>
      %c0_32 = arith.constant 0 : index
      %c0_33 = arith.constant 0 : index
      %c0_34 = arith.constant 0 : index
      %43 = vector.load %arg7[%c0_32, %c0_33, %c0_34] : memref<1x1x128xf32, #tpu.memory_space<vmem>>, vector<1x1x128xf32>
      %44 = vector.shape_cast %43 : vector<1x1x128xf32> to vector<1x128xf32>
      %45 = vector.shape_cast %42 : vector<1x128xf32> to vector<1x1x128xf32>
      tpu.vector_store %arg7[%c0_32, %c0_33, %c0_34], %45 {strides = array<i32>} : memref<1x1x128xf32, #tpu.memory_space<vmem>>, vector<1x1x128xf32>,
    } else {
    }
    return
  }
  func.func @transform_0(%arg0: i32, %arg1: i32) -> (i32, i32, i32) {
    %c0_i32 = arith.constant 0 : i32
    %c0_i32_0 = arith.constant 0 : i32
    return %arg0, %c0_i32, %arg1 : i32, i32, i32
  }
  func.func @transform_1(%arg0: i32, %arg1: i32) -> (i32, i32) {
    %c0_i32 = arith.constant 0 : i32
    %c0_i32_0 = arith.constant 0 : i32
    %c0_i32_1 = arith.constant 0 : i32
    return %c0_i32, %c0_i32_0 : i32, i32
  }
  func.func @transform_2(%arg0: i32, %arg1: i32) -> (i32, i32) {
    %c0_i32 = arith.constant 0 : i32
    %c0_i32_0 = arith.constant 0 : i32
    %c0_i32_1 = arith.constant 0 : i32
    return %c0_i32, %c0_i32_0 : i32, i32
  }
  func.func @transform_3(%arg0: i32, %arg1: i32) -> (i32, i32) {
    %c0_i32 = arith.constant 0 : i32
    %c0_i32_0 = arith.constant 0 : i32
    %c0_i32_1 = arith.constant 0 : i32
    return %c0_i32, %c0_i32_0 : i32, i32
  }
  func.func @transform_4(%arg0: i32, %arg1: i32) -> (i32, i32) {
    %c0_i32 = arith.constant 0 : i32
    %c0_i32_0 = arith.constant 0 : i32
    %c0_i32_1 = arith.constant 0 : i32
    return %c0_i32, %c0_i32_0 : i32, i32
  }
  func.func @transform_5(%arg0: i32, %arg1: i32) -> (i32, i32, i32) {
    %c0_i32 = arith.constant 0 : i32
    %c0_i32_0 = arith.constant 0 : i32
    %c0_i32_1 = arith.constant 0 : i32
    return %arg0, %c0_i32, %c0_i32_0 : i32, i32, i32
  }
}

</mosaic_0001>

<bundles_post_ra>
// kernel: deepdr_vbc_predict.1
= control target key start
LH: loop header
LB: loop body
LE: loop exit
PB: predicated region body
PF: predicated region fallthrough
CT: control target
= control target key end

     0   :  { %s702_s18 = smov 0   ;;  %s704_s19 = smov 0   ;;  %s796_s0 = inlined_call_operand.vmem [shape: f32[2,4,256], index: 0, kind: input, shape index: {}]   ;;  %s797_s1 = inlined_call_operand.vmem [shape: f32[4,128], index: 1, kind: input, shape index: {}]   ;;  %s798_s2 = inlined_call_operand.vmem [shape: f32[1,128], index: 2, kind: input, shape index: {}]   ;;  %s799_s3 = inlined_call_operand.vmem [shape: f32[128,128], index: 3, kind: input, shape index: {}]   ;;  %s800_s4 = inlined_call_operand.vmem [shape: f32[1,128], index: 4, kind: input, shape index: {}]   ;;  %s801_s5 = inlined_call_operand.vmem [shape: f32[2,1,128], index: 5, kind: output, shape index: {}]  }
   0x1   :  { %s706_s20 = smov 0  }
   0x2 LB: > { %s27_s21 = sadd.s32 1, %s663_s19  ;;  %p522_p0 = scmp.ge.s32.totalorder %s667_s20, 1  ;;  %s667_s20 = sphi %s706_s20, %s15_s20   ;;  %s663_s19 = sphi %s704_s19, %s803_s19   ;;  %s659_s18 = sphi %s702_s18, %s802_s18  }
   0x3   : > { %p29_p1 = scmp.ge.s32.totalorder %s27_s21, 2  ;;  %p206_p2 = scmp.lt.s32.totalorder %s667_s20, 3 }
   0x5   : > { %s805_s21 = smov (%p29_p1, %s27_s21), 0  ;;  %p207_p3 = pnand %p522_p0, %p206_p2 }
   0x6   : > { %p237_p4 = scmp.lt.s32.totalorder (!%p207_p3), %s659_s18, 1  ;;  %v669_v0 = vmov (!%p207_p3), 0.0   ;;  %vm266_vm0 = vcmask (!%p207_p3), 1043456   ;;  %v271_v8 = vld [vmem:[%s797_s1] sm:$0xf] (!%p207_p3)  ;;  %vm670_vm1 = vmmov (!%p207_p3), 0   ;;  %v274_v31 = vlaneseq (!%p207_p3) }
   0x7   : > { %210 = sbr.rel (%p207_p3) target bundleno = 922 (0x39a), region = 40  ;;  %253 = vst [vmem:[#allocation2] sm:$0xf] (!%p207_p3), %v669_v0  ;;  %550 = vmatprep.subr.mxu0 (!%p207_p3), %v669_v0  ;;  %552 = vmatprep.mubr.msk.f32.mxu0 (!%p207_p3), %vm670_vm1, %v669_v0  ;;  %v357_v9 = vld [vmem:[%s799_s3] sm:$0xff] (!%p207_p3)  ;;  %v358_v10 = vld [vmem:[%s799_s3 + $0x8] sm:$0xff] (!%p207_p3)  ;;  %v359_v11 = vld [vmem:[%s799_s3 + $0x10] sm:$0xff] (!%p207_p3) }
   0x8   : > { %551 = vmatpush3.msk.msra.mxu0 (!%p207_p3), %vm266_vm0, %v271_v8  ;;  %587 = vmatprep.mubr.msk.f32.mxu1 (!%p207_p3), %vm670_vm1, %v669_v0  ;;  %v671_v12 = vmov (!%p207_p3), 0.0|0.0   ;;  %v591_v13 = vpack.c.bf16 (!%p207_p3), %v358_v10, %v357_v9  ;;  %v360_v14 = vld [vmem:[%s799_s3 + $0x18] sm:$0xff] (!%p207_p3)  ;;  %v361_v16 = vld [vmem:[%s799_s3 + $0x20] sm:$0xff] (!%p207_p3)  ;;  %v362_v17 = vld [vmem:[%s799_s3 + $0x28] sm:$0xff] (!%p207_p3)  ;;  %v275_v32 = vand.u32 (!%p207_p3), 127, %v274_v31  ;;  %v277_v33 = vshrl.u32 (!%p207_p3), %v274_v31, 7 }
   0x9   : > { %590 = vmatprep.subr.bf16.mxu1 (!%p207_p3), %v671_v12  ;;  %v594_v15 = vpack.c.bf16 (!%p207_p3), %v360_v14, %v359_v11  ;;  %v597_v18 = vpack.c.bf16 (!%p207_p3), %v362_v17, %v361_v16  ;;  %v363_v19 = vld [vmem:[%s799_s3 + $0x30] sm:$0xff] (!%p207_p3)  ;;  %v364_v20 = vld [vmem:[%s799_s3 + $0x38] sm:$0xff] (!%p207_p3)  ;;  %v365_v22 = vld [vmem:[%s799_s3 + $0x40] sm:$0xff] (!%p207_p3)  ;;  %vm280_vm2 = vcmask (!%p207_p3), 31744   ;;  %vm444_vm3 = vcmask (!%p207_p3), 1040384  }
   0xa   : > { %592 = vmatpush3.bf16.msra.mxu1 (!%p207_p3), %v591_v13  ;;  %v600_v21 = vpack.c.bf16 (!%p207_p3), %v364_v20, %v363_v19  ;;  %v366_v23 = vld [vmem:[%s799_s3 + $0x48] sm:$0xff] (!%p207_p3)  ;;  %v367_v25 = vld [vmem:[%s799_s3 + $0x50] sm:$0xff] (!%p207_p3)  ;;  %v368_v26 = vld [vmem:[%s799_s3 + $0x58] sm:$0xff] (!%p207_p3)  ;;  %v278_v34 = vsub.s32 (!%p207_p3), %v275_v32, %v277_v33 }
   0xb   : > { %593 = vmatprep.subr.bf16.mxu1 (!%p207_p3), %v671_v12  ;;  %v603_v24 = vpack.c.bf16 (!%p207_p3), %v366_v23, %v365_v22  ;;  %v606_v27 = vpack.c.bf16 (!%p207_p3), %v368_v26, %v367_v25  ;;  %v369_v28 = vld [vmem:[%s799_s3 + $0x60] sm:$0xff] (!%p207_p3)  ;;  %v370_v29 = vld [vmem:[%s799_s3 + $0x68] sm:$0xff] (!%p207_p3)  ;;  %v371_v38 = vld [vmem:[%s799_s3 + $0x70] sm:$0xff] (!%p207_p3) }
   0xc   : > { %v609_v30 = vpack.c.bf16 (!%p207_p3), %v370_v29, %v369_v28  ;;  %v372_v39 = vld [vmem:[%s799_s3 + $0x78] sm:$0xff] (!%p207_p3)  ;;  %v272_v41 = vld [vmem:[%s798_s2] sm:$0x1] (!%p207_p3) }
   0xd   : > { %v612_v40 = vpack.c.bf16 (!%p207_p3), %v372_v39, %v371_v38  ;;  %v373_v46 = vld [vmem:[%s800_s4] sm:$0x1] (!%p207_p3) }
   0xe   : > { %s807_s18 = smov (!%p237_p4, %s659_s18), 1  ;;  %v254_v4 = vld [vmem:[#allocation2] sm:$0xf]  ;;  %595 = vmatpush3.bf16.msra.mxu1 %v594_v15 }
   0xf   : > { %s530_s22 = sshll.u32 %s807_s18, 3  ;;  %596 = vmatprep.subr.bf16.mxu1 %v671_v12  ;;  %s248_s24 = scalar_lea.vmem %s801_s5, %s807_s18 }
  0x10   : > { %s244_s25 = scalar_lea.vmem %s796_s0, %s530_s22 }
  0x11   : > { %v255_v1 = vld [vmem:[%s244_s25] sm:$0xf]  ;;  %v525_v2 = vld [vmem:[%s244_s25 + $0x4] sm:$0xf] }
  0x12   : > { %v259_v3 = vadd.f32 %v525_v2, %v255_v1  ;;  %598 = vmatpush3.bf16.msra.mxu1 %v597_v18 }
  0x13   : > { %599 = vmatprep.subr.bf16.mxu1 %v671_v12 }
  0x14   : > { %v260_v5 = vadd.f32 %v259_v3, %v254_v4 }
  0x16   : > { %261 = vst [vmem:[#allocation2] sm:$0xf] %v260_v5  ;;  %601 = vmatpush3.bf16.msra.mxu1 %v600_v21 }
  0x17   : > { %602 = vmatprep.subr.bf16.mxu1 %v671_v12 }
  0x1a   : > { %604 = vmatpush3.bf16.msra.mxu1 %v603_v24 }
  0x1b   : > { %605 = vmatprep.subr.bf16.mxu1 %v671_v12 }
  0x1d   : > { %v265_v6 = vld [vmem:[#allocation2] sm:$0xf] }
  0x1e   : > { %v267_v7 = vsel %vm266_vm0, %v265_v6, 0.0  ;;  %607 = vmatpush3.bf16.msra.mxu1 %v606_v27 }
  0x1f   : > { %268 = vadd.xlane.f32.xlu0 %v267_v7  ;;  %608 = vmatprep.subr.bf16.mxu1 %v671_v12 }
  0x22   : > { %610 = vmatpush3.bf16.msra.mxu1 %v609_v30 }
  0x23   : > { %611 = vmatprep.subr.bf16.mxu1 %v671_v12 }
  0x26   : > { %613 = vmatpush3.bf16.msra.mxu1 %v612_v40 }
  0xac   : > { %v269_v35 = vpop.xlane.xlu0 %268 }
  0xad   : > { %v270_v36 = vmul.f32 0.00390625, %v269_v35 }
  0xaf   : > { %v279_v37 = vrot.slane %v270_v36, %v278_v34 }
  0xb1   : > { %553 = vmatmul.mubr.msk.f32.vlgmr.msra.gmra.mrb[0].mxu0 %vm280_vm2, %v279_v37 }
 0x184   : > { %v352_v42 = vpop.f32.mrb[0].mxu0 }
 0x185   : > { %v353_v43 = vadd.f32 %v352_v42, %v272_v41  ;;  %v554_v44 = vpop.f32.mrb[1].mxu0 }
 0x187   : > { %v356_v45 = vmax.f32 %v353_v43, 0.0 }
 0x189   : > { %588 = vmatmul.mubr.f32.vlgmr.msra.gmra.mrb[0].mxu1 %v356_v45 }
 0x25c   : > { %v440_v47 = vpop.f32.mrb[0].mxu1 }
 0x25d   : > { %v441_v48 = vadd.f32 %v440_v47, %v373_v46  ;;  %v589_v49 = vpop.f32.mrb[1].mxu1 }
 0x25f   : > { %v445_v50 = vsel %vm444_vm3, %v441_v48, -inf }
 0x260   : > { %446 = vmax.xlane.f32.xlu0 %v445_v50 }
 0x2ed   : > { %v447_v51 = vpop.xlane.xlu0 %446 }
 0x2ee   : > { %v448_v52 = vsub.f32 %v441_v48, %v447_v51 }
 0x2f0   : > { %v449_v53 = vmul.f32 1.442695, %v448_v52 }
 0x2f2   : > { %641 = vpow2.f32 %v449_v53 }
 0x2fc   : > { %v642_v54 = vpop.eup %641 }
 0x2fd   : > { %v451_v55 = vsel %vm444_vm3, %v642_v54, 0.0 }
 0x2fe   : > { %452 = vadd.xlane.f32.xlu1 %v451_v55 }
 0x38b   : > { %v453_v56 = vpop.xlane.xlu1 %452 }
 0x38c   : > { %643 = vrcp.f32 %v453_v56 }
 0x396   : > { %v644_v57 = vpop.eup %643 }
 0x397   : > { %v455_v58 = vmul.f32 %v644_v57, %v642_v54 }
 0x399   : > { %456 = vst [vmem:[%s248_s24] sm:$0x1] %v455_v58 }
 0x39a PF: > { %s15_s20 = sadd.s32 1, %s667_s20   ;;  %s802_s18 = smov %s663_s19 }
 0x39b   : > { %p12_p5 = scmp.ge.s32.totalorder %s15_s20, 4   ;;  %s803_s19 = smov %s805_s21 }
 0x39d   :  { %14 = sbr.rel (!%p12_p5) target bundleno = 2 (0x2), region = 79 }

</bundles_post_ra>
